<compile_context>
chip_gen: v7x
topology: tpu7x:2x2x1
jax: 0.10.0
libtpu: 0.0.40
codegen_flags: <defaults>
</compile_context>

<pallas_src>
import jax
import jax.numpy as jnp
from jax import lax
from jax.experimental import pallas as pl
from jax.experimental.pallas import tpu as pltpu


def _make_resblock_kernel(H, W, Cin, Cout, nb):
    HW = H * W
    L = nb * HW  # lane width of one grid step (nb images stacked along lanes)

    def kernel(mask_ref, x_ref, w1sc_ref, w2t_ref, bias_ref, out_ref, p_ref):
        """One grid step = `nb` images, lane-stacked.

        mask_ref : (9, L) f32       per-tap boundary mask (zero where the 3x3 tap
                                    leaves its image; also kills every cross-image
                                    wrap of the lane roll)
        x_ref    : (Cin, L) f32     channels on sublanes, nb*H*W pixels on lanes
        w1sc_ref : (2*Cout, 9*Cin)  bf16  conv1 weights (BN1 folded) stacked over the
                                    1x1 shortcut weights (BNsc folded, centre tap)
        w2t_ref  : (Cout, 9*Cout)   bf16  conv2 weights (BN2 folded)
        bias_ref : (Cout, 2) f32    col 0: BN1 bias, col 1: BN2 bias + BNsc bias
        out_ref  : (Cout, L) f32
        p_ref    : (9*max(Cin,Cout), L) bf16  shared im2col scratch
        """

        def fill_patches(a, rows):
            # a: (rows, L) f32.  Writes the 9 spatially shifted, masked copies of `a`
            # (3x3 taps, row-major) into p_ref[:9*rows].  Shifts are lane rotations
            # (XLU); masking is one broadcast multiply per tap (VPU); the cast to
            # bf16 happens only at the store (MXU boundary).  Every written row is
            # fully overwritten each step, so the scratch never needs zeroing.
            for t in range(9):
                dy, dx = t // 3 - 1, t % 3 - 1
                shift = dy * W + dx
                if shift == 0:
                    patch = a                                   # centre tap, mask==1
                else:
                    patch = pltpu.roll(a, shift=(-shift) % L, axis=1)
                    patch = patch * mask_ref[t:t + 1, :]
                p_ref[t * rows:(t + 1) * rows, :] = patch.astype(p_ref.dtype)

        # ---- conv1 (3x3) + fused 1x1 shortcut: one fat MXU matmul ---------------
        fill_patches(x_ref[...], Cin)
        res = jnp.dot(w1sc_ref[...], p_ref[0:9 * Cin, :],
                      preferred_element_type=jnp.float32)            # (2*Cout, L)
        y1 = jnp.maximum(res[:Cout, :] + bias_ref[:, 0:1], 0.0)      # BN1 + ReLU
        sc = res[Cout:, :]                                           # shortcut (+BNsc)

        # ---- conv2 (3x3) + BN2, residual add, final ReLU ------------------------
        fill_patches(y1, Cout)
        y2 = jnp.dot(w2t_ref[...], p_ref[0:9 * Cout, :],
                     preferred_element_type=jnp.float32)             # (Cout, L)
        out_ref[...] = jnp.maximum(y2 + bias_ref[:, 1:2] + sc,
                                   0.0).astype(out_ref.dtype)

    return kernel


def _fold_bn(gamma, beta, mean, var, eps=1e-5):
    scale = gamma / jnp.sqrt(var + eps)
    bias = beta - mean * scale
    return scale, bias


def _pick_images_per_step(N, HW, max_lanes=4096):
    """Largest nb dividing N with nb*HW <= max_lanes, keeping >= 2 grid steps
    whenever N >= 2 (so both v7x TensorCores get work)."""
    best = 1
    for nb in range(1, N + 1):
        if N % nb != 0 or nb * HW > max_lanes:
            continue
        if N >= 2 and N // nb < 2:
            continue
        best = nb
    return best


@jax.jit
def resblock_forward(x_nchw, params):
    """ResBlock forward. Input/output are NCHW (PyTorch convention), f32."""
    N, Cin, H, W = x_nchw.shape
    Cout = params["w1"].shape[-1]
    HW = H * W
    # The fused conv1+shortcut result is split at row Cout; keep it tile-aligned.
    assert Cout % 8 == 0, "Cout must be a multiple of 8"

    nb = _pick_images_per_step(N, HW)
    G = N // nb
    L = nb * HW

    # ---- wrapper-side BN folding + weight packing (bf16 matmul operands) --------
    s1, b1 = _fold_bn(*params["bn1"])
    s2, b2 = _fold_bn(*params["bn2"])
    ssc, bsc = _fold_bn(*params["bnsc"])

    w1_t = params["w1"].reshape(9 * Cin, Cout).T * s1[:, None]       # (Cout, 9*Cin)
    wsc_t = params["wsc"].T * ssc[:, None]                           # (Cout, Cin)
    w1sc = jnp.zeros((2 * Cout, 9 * Cin), jnp.float32)
    w1sc = w1sc.at[:Cout, :].set(w1_t)
    w1sc = w1sc.at[Cout:, 4 * Cin:5 * Cin].set(wsc_t)                # centre tap only
    w2t = params["w2"].reshape(9 * Cout, Cout).T * s2[:, None]       # (Cout, 9*Cout)
    w1sc = w1sc.astype(jnp.bfloat16)
    w2t = w2t.astype(jnp.bfloat16)
    bias = jnp.stack([b1, b2 + bsc], axis=1).astype(jnp.float32)     # (Cout, 2)

    # ---- per-tap boundary masks, precomputed once (replaces in-kernel iota/cmp) --
    pos = jnp.arange(HW, dtype=jnp.int32)
    hh, ww = pos // W, pos % W
    mask_rows = []
    for t in range(9):
        dy, dx = t // 3 - 1, t % 3 - 1
        valid = jnp.ones((HW,), jnp.bool_)
        if dy == 1:
            valid = valid & (hh < H - 1)
        elif dy == -1:
            valid = valid & (hh >= 1)
        if dx == 1:
            valid = valid & (ww < W - 1)
        elif dx == -1:
            valid = valid & (ww >= 1)
        mask_rows.append(valid)
    mask = jnp.stack(mask_rows, axis=0).astype(jnp.float32)          # (9, HW)
    mask = jnp.tile(mask, (1, nb))                                   # (9, L)

    # Lane-stacked activation layout: lane index = image*HW + pixel.
    x_ls = jnp.transpose(x_nchw.reshape(N, Cin, HW).astype(jnp.float32),
                         (1, 0, 2)).reshape(Cin, N * HW)

    out_ls = pl.pallas_call(
        _make_resblock_kernel(H, W, Cin, Cout, nb),
        out_shape=jax.ShapeDtypeStruct((Cout, N * HW), jnp.float32),
        grid_spec=pltpu.PrefetchScalarGridSpec(
            num_scalar_prefetch=0,
            grid=(G,),
            in_specs=[
                pl.BlockSpec((9, L), lambda g: (0, 0)),              # masks
                pl.BlockSpec((Cin, L), lambda g: (0, g)),            # activations
                pl.BlockSpec((2 * Cout, 9 * Cin), lambda g: (0, 0)),  # w1 + shortcut
                pl.BlockSpec((Cout, 9 * Cout), lambda g: (0, 0)),     # w2
                pl.BlockSpec((Cout, 2), lambda g: (0, 0)),            # biases
            ],
            out_specs=pl.BlockSpec((Cout, L), lambda g: (0, g)),
            scratch_shapes=[
                pltpu.VMEM((9 * max(Cin, Cout), L), jnp.bfloat16),   # shared im2col
            ],
        ),
        compiler_params=pltpu.CompilerParams(
            dimension_semantics=("parallel",)),
    )(mask, x_ls, w1sc, w2t, bias)

    out = jnp.transpose(out_ls.reshape(Cout, N, HW), (1, 0, 2))
    return out.reshape(N, Cout, H, W)


def resblock_reference(x_nchw, params, eps=1e-5):
    """Pure-JAX reference (lax.conv) for validation."""
    x = jnp.transpose(x_nchw, (0, 2, 3, 1))

    def bn(y, p):
        gamma, beta, mean, var = p
        return (y - mean) / jnp.sqrt(var + eps) * gamma + beta

    def conv(y, w):
        return lax.conv_general_dilated(
            y, w, (1, 1), "SAME",
            dimension_numbers=("NHWC", "HWIO", "NHWC"))

    y = jax.nn.relu(bn(conv(x, params["w1"]), params["bn1"]))
    y = bn(conv(y, params["w2"]), params["bn2"])
    cin, cout = params["wsc"].shape
    sc = bn(conv(x, params["wsc"].reshape(1, 1, cin, cout)), params["bnsc"])
    out = jax.nn.relu(y + sc)
    return jnp.transpose(out, (0, 3, 1, 2))


def _make_bn_params(c, tag):
    gamma = 1.0 + 0.10 * jnp.arange(c, dtype=jnp.float32)
    beta = 0.05 * jnp.arange(c, dtype=jnp.float32) - 0.10
    mean = 0.02 * (tag + 1) * jnp.arange(c, dtype=jnp.float32)
    var = 0.50 + 0.05 * jnp.arange(c, dtype=jnp.float32)
    return (gamma, beta, mean, var)


if __name__ == "__main__":
    # N=4 so the lane-stacking path (nb=2 images per grid step) and the 2-step grid
    # are both exercised.
    N, Cin, Cout, H, W = 4, 4, 8, 16, 16
    key = jax.random.PRNGKey(0)
    k_w1, k_w2, k_wsc, k_x = jax.random.split(key, 4)

    params = {
        # weights stored HWIO (equivalent to PyTorch OIHW up to our own init)
        "w1": 0.1 * jax.random.normal(k_w1, (3, 3, Cin, Cout), jnp.float32),
        "w2": 0.1 * jax.random.normal(k_w2, (3, 3, Cout, Cout), jnp.float32),
        "wsc": 0.1 * jax.random.normal(k_wsc, (Cin, Cout), jnp.float32),
        "bn1": _make_bn_params(Cout, 0),
        "bn2": _make_bn_params(Cout, 1),
        "bnsc": _make_bn_params(Cout, 2),
    }

    x = jax.random.normal(k_x, (N, Cin, H, W), jnp.float32)

    out = jax.block_until_ready(resblock_forward(x, params))
    ref = resblock_reference(x, params)

    assert out.shape == (N, Cout, H, W), out.shape
    max_err = float(jnp.max(jnp.abs(out - ref)))
    ref_max = float(jnp.max(jnp.abs(ref)))
    tol = 5e-2 * max(1.0, ref_max)        # bf16 matmul operands -> ~1e-2 rel error
    assert max_err < tol, f"max abs error {max_err} (tol {tol})"

    print("KERNEL_OK")
</pallas_src>

<mosaic_0001>
module attributes {stable_mosaic.version = 11 : i64} {
  func.func @kernel(%arg0: i32, %arg1: memref<9x512xf32, #tpu.memory_space<vmem>>, %arg2: memref<4x512xf32, #tpu.memory_space<vmem>>, %arg3: memref<16x36xbf16, #tpu.memory_space<vmem>>, %arg4: memref<8x72xbf16, #tpu.memory_space<vmem>>, %arg5: memref<8x2xf32, #tpu.memory_space<vmem>>, %arg6: memref<8x512xf32, #tpu.memory_space<vmem>>, %arg7: memref<72x512xbf16, #tpu.memory_space<vmem>>) attributes {dimension_semantics = [#tpu.dimension_semantics<parallel>], iteration_bounds = array<i64: 2>, scalar_prefetch = 0 : i64, scratch_operands = 1 : i64, tpu.core_type = #tpu.core_type<tc>, window_params = [{pipeline_mode = #tpu.pipeline_mode<synchronous>, transform_indices = @transform_0, window_bounds = array<i64: 9, 512>}, {transform_indices = @transform_1, window_bounds = array<i64: 4, 512>}, {pipeline_mode = #tpu.pipeline_mode<synchronous>, transform_indices = @transform_2, window_bounds = array<i64: 16, 36>}, {pipeline_mode = #tpu.pipeline_mode<synchronous>, transform_indices = @transform_3, window_bounds = array<i64: 8, 72>}, {pipeline_mode = #tpu.pipeline_mode<synchronous>, transform_indices = @transform_4, window_bounds = array<i64: 8, 2>}, {transform_indices = @transform_5, window_bounds = array<i64: 8, 512>}]} {
    %c0 = arith.constant 0 : index
    %c0_0 = arith.constant 0 : index
    %0 = vector.load %arg2[%c0, %c0_0] : memref<4x512xf32, #tpu.memory_space<vmem>>, vector<4x512xf32>
    %c17_i32 = arith.constant 17 : i32
    %1 = tpu.dynamic_rotate %0 by %c17_i32 dim 1 : vector<4x512xf32>, i32 -> vector<4x512xf32>
    %c0_1 = arith.constant 0 : index
    %c0_2 = arith.constant 0 : index
    %2 = vector.load %arg1[%c0_1, %c0_2] : memref<9x512xf32, #tpu.memory_space<vmem>>, vector<1x512xf32>
    %3 = vector.broadcast %2 : vector<1x512xf32> to vector<4x512xf32>
    %4 = arith.mulf %1, %3 : vector<4x512xf32>
    %5 = arith.truncf %4 : vector<4x512xf32> to vector<4x512xbf16>
    %c0_3 = arith.constant 0 : index
    %c0_4 = arith.constant 0 : index
    %6 = vector.load %arg7[%c0_3, %c0_4] : memref<72x512xbf16, #tpu.memory_space<vmem>>, vector<4x512xbf16>
    tpu.vector_store %arg7[%c0_3, %c0_4], %5 {strides = array<i32>} : memref<72x512xbf16, #tpu.memory_space<vmem>>, vector<4x512xbf16>,
    %c16_i32 = arith.constant 16 : i32
    %7 = tpu.dynamic_rotate %0 by %c16_i32 dim 1 : vector<4x512xf32>, i32 -> vector<4x512xf32>
    %c1 = arith.constant 1 : index
    %c0_5 = arith.constant 0 : index
    %8 = vector.load %arg1[%c1, %c0_5] : memref<9x512xf32, #tpu.memory_space<vmem>>, vector<1x512xf32>
    %9 = vector.broadcast %8 : vector<1x512xf32> to vector<4x512xf32>
    %10 = arith.mulf %7, %9 : vector<4x512xf32>
    %11 = arith.truncf %10 : vector<4x512xf32> to vector<4x512xbf16>
    %c4 = arith.constant 4 : index
    %c0_6 = arith.constant 0 : index
    %12 = vector.load %arg7[%c4, %c0_6] : memref<72x512xbf16, #tpu.memory_space<vmem>>, vector<4x512xbf16>
    tpu.vector_store %arg7[%c4, %c0_6], %11 {strides = array<i32>} : memref<72x512xbf16, #tpu.memory_space<vmem>>, vector<4x512xbf16>,
    %c15_i32 = arith.constant 15 : i32
    %13 = tpu.dynamic_rotate %0 by %c15_i32 dim 1 : vector<4x512xf32>, i32 -> vector<4x512xf32>
    %c2 = arith.constant 2 : index
    %c0_7 = arith.constant 0 : index
    %14 = vector.load %arg1[%c2, %c0_7] : memref<9x512xf32, #tpu.memory_space<vmem>>, vector<1x512xf32>
    %15 = vector.broadcast %14 : vector<1x512xf32> to vector<4x512xf32>
    %16 = arith.mulf %13, %15 : vector<4x512xf32>
    %17 = arith.truncf %16 : vector<4x512xf32> to vector<4x512xbf16>
    %c8 = arith.constant 8 : index
    %c0_8 = arith.constant 0 : index
    %18 = vector.load %arg7[%c8, %c0_8] : memref<72x512xbf16, #tpu.memory_space<vmem>>, vector<4x512xbf16>
    tpu.vector_store %arg7[%c8, %c0_8], %17 {strides = array<i32>} : memref<72x512xbf16, #tpu.memory_space<vmem>>, vector<4x512xbf16>,
    %c1_i32 = arith.constant 1 : i32
    %19 = tpu.dynamic_rotate %0 by %c1_i32 dim 1 : vector<4x512xf32>, i32 -> vector<4x512xf32>
    %c3 = arith.constant 3 : index
    %c0_9 = arith.constant 0 : index
    %20 = vector.load %arg1[%c3, %c0_9] : memref<9x512xf32, #tpu.memory_space<vmem>>, vector<1x512xf32>
    %21 = vector.broadcast %20 : vector<1x512xf32> to vector<4x512xf32>
    %22 = arith.mulf %19, %21 : vector<4x512xf32>
    %23 = arith.truncf %22 : vector<4x512xf32> to vector<4x512xbf16>
    %c12 = arith.constant 12 : index
    %c0_10 = arith.constant 0 : index
    %24 = vector.load %arg7[%c12, %c0_10] : memref<72x512xbf16, #tpu.memory_space<vmem>>, vector<4x512xbf16>
    tpu.vector_store %arg7[%c12, %c0_10], %23 {strides = array<i32>} : memref<72x512xbf16, #tpu.memory_space<vmem>>, vector<4x512xbf16>,
    %25 = arith.truncf %0 : vector<4x512xf32> to vector<4x512xbf16>
    %c16 = arith.constant 16 : index
    %c0_11 = arith.constant 0 : index
    %26 = vector.load %arg7[%c16, %c0_11] : memref<72x512xbf16, #tpu.memory_space<vmem>>, vector<4x512xbf16>
    tpu.vector_store %arg7[%c16, %c0_11], %25 {strides = array<i32>} : memref<72x512xbf16, #tpu.memory_space<vmem>>, vector<4x512xbf16>,
    %c511_i32 = arith.constant 511 : i32
    %27 = tpu.dynamic_rotate %0 by %c511_i32 dim 1 : vector<4x512xf32>, i32 -> vector<4x512xf32>
    %c5 = arith.constant 5 : index
    %c0_12 = arith.constant 0 : index
    %28 = vector.load %arg1[%c5, %c0_12] : memref<9x512xf32, #tpu.memory_space<vmem>>, vector<1x512xf32>
    %29 = vector.broadcast %28 : vector<1x512xf32> to vector<4x512xf32>
    %30 = arith.mulf %27, %29 : vector<4x512xf32>
    %31 = arith.truncf %30 : vector<4x512xf32> to vector<4x512xbf16>
    %c20 = arith.constant 20 : index
    %c0_13 = arith.constant 0 : index
    %32 = vector.load %arg7[%c20, %c0_13] : memref<72x512xbf16, #tpu.memory_space<vmem>>, vector<4x512xbf16>
    tpu.vector_store %arg7[%c20, %c0_13], %31 {strides = array<i32>} : memref<72x512xbf16, #tpu.memory_space<vmem>>, vector<4x512xbf16>,
    %c497_i32 = arith.constant 497 : i32
    %33 = tpu.dynamic_rotate %0 by %c497_i32 dim 1 : vector<4x512xf32>, i32 -> vector<4x512xf32>
    %c6 = arith.constant 6 : index
    %c0_14 = arith.constant 0 : index
    %34 = vector.load %arg1[%c6, %c0_14] : memref<9x512xf32, #tpu.memory_space<vmem>>, vector<1x512xf32>
    %35 = vector.broadcast %34 : vector<1x512xf32> to vector<4x512xf32>
    %36 = arith.mulf %33, %35 : vector<4x512xf32>
    %37 = arith.truncf %36 : vector<4x512xf32> to vector<4x512xbf16>
    %c24 = arith.constant 24 : index
    %c0_15 = arith.constant 0 : index
    %38 = vector.load %arg7[%c24, %c0_15] : memref<72x512xbf16, #tpu.memory_space<vmem>>, vector<4x512xbf16>
    tpu.vector_store %arg7[%c24, %c0_15], %37 {strides = array<i32>} : memref<72x512xbf16, #tpu.memory_space<vmem>>, vector<4x512xbf16>,
    %c496_i32 = arith.constant 496 : i32
    %39 = tpu.dynamic_rotate %0 by %c496_i32 dim 1 : vector<4x512xf32>, i32 -> vector<4x512xf32>
    %c7 = arith.constant 7 : index
    %c0_16 = arith.constant 0 : index
    %40 = vector.load %arg1[%c7, %c0_16] : memref<9x512xf32, #tpu.memory_space<vmem>>, vector<1x512xf32>
    %41 = vector.broadcast %40 : vector<1x512xf32> to vector<4x512xf32>
    %42 = arith.mulf %39, %41 : vector<4x512xf32>
    %43 = arith.truncf %42 : vector<4x512xf32> to vector<4x512xbf16>
    %c28 = arith.constant 28 : index
    %c0_17 = arith.constant 0 : index
    %44 = vector.load %arg7[%c28, %c0_17] : memref<72x512xbf16, #tpu.memory_space<vmem>>, vector<4x512xbf16>
    tpu.vector_store %arg7[%c28, %c0_17], %43 {strides = array<i32>} : memref<72x512xbf16, #tpu.memory_space<vmem>>, vector<4x512xbf16>,
    %c495_i32 = arith.constant 495 : i32
    %45 = tpu.dynamic_rotate %0 by %c495_i32 dim 1 : vector<4x512xf32>, i32 -> vector<4x512xf32>
    %c8_18 = arith.constant 8 : index
    %c0_19 = arith.constant 0 : index
    %46 = vector.load %arg1[%c8_18, %c0_19] : memref<9x512xf32, #tpu.memory_space<vmem>>, vector<1x512xf32>
    %47 = vector.broadcast %46 : vector<1x512xf32> to vector<4x512xf32>
    %48 = arith.mulf %45, %47 : vector<4x512xf32>
    %49 = arith.truncf %48 : vector<4x512xf32> to vector<4x512xbf16>
    %c32 = arith.constant 32 : index
    %c0_20 = arith.constant 0 : index
    %50 = vector.load %arg7[%c32, %c0_20] : memref<72x512xbf16, #tpu.memory_space<vmem>>, vector<4x512xbf16>
    tpu.vector_store %arg7[%c32, %c0_20], %49 {strides = array<i32>} : memref<72x512xbf16, #tpu.memory_space<vmem>>, vector<4x512xbf16>,
    %c0_21 = arith.constant 0 : index
    %c0_22 = arith.constant 0 : index
    %51 = vector.load %arg3[%c0_21, %c0_22] : memref<16x36xbf16, #tpu.memory_space<vmem>>, vector<16x36xbf16>
    %c0_23 = arith.constant 0 : index
    %c0_24 = arith.constant 0 : index
    %52 = vector.load %arg7[%c0_23, %c0_24] : memref<72x512xbf16, #tpu.memory_space<vmem>>, vector<36x512xbf16>
    %cst = arith.constant dense<0.000000e+00> : vector<16x512xf32>
    %53 = tpu.matmul %51, %52, %cst {dimension_numbers = #tpu.dot_dimension_numbers<[1], [0], [0], [1], [0, 0, 1, 1], [], []>} : vector<16x36xbf16>, vector<36x512xbf16>, vector<16x512xf32> -> vector<16x512xf32>
    %54 = vector.extract_strided_slice %53 {offsets = [0, 0], sizes = [8, 512], strides = [1, 1]} : vector<16x512xf32> to vector<8x512xf32>
    %c0_25 = arith.constant 0 : index
    %c0_26 = arith.constant 0 : index
    %55 = vector.load %arg5[%c0_25, %c0_26] : memref<8x2xf32, #tpu.memory_space<vmem>>, vector<8x1xf32>
    %56 = vector.broadcast %55 : vector<8x1xf32> to vector<8x512xf32>
    %57 = arith.addf %54, %56 : vector<8x512xf32>
    %cst_27 = arith.constant 0.000000e+00 : f32
    %58 = vector.broadcast %cst_27 : f32 to vector<8x512xf32>
    %59 = arith.maximumf %57, %58 : vector<8x512xf32>
    %60 = vector.extract_strided_slice %53 {offsets = [8, 0], sizes = [8, 512], strides = [1, 1]} : vector<16x512xf32> to vector<8x512xf32>
    %c17_i32_28 = arith.constant 17 : i32
    %61 = tpu.dynamic_rotate %59 by %c17_i32_28 dim 1 : vector<8x512xf32>, i32 -> vector<8x512xf32>
    %c0_29 = arith.constant 0 : index
    %c0_30 = arith.constant 0 : index
    %62 = vector.load %arg1[%c0_29, %c0_30] : memref<9x512xf32, #tpu.memory_space<vmem>>, vector<1x512xf32>
    %63 = vector.broadcast %62 : vector<1x512xf32> to vector<8x512xf32>
    %64 = arith.mulf %61, %63 : vector<8x512xf32>
    %65 = arith.truncf %64 : vector<8x512xf32> to vector<8x512xbf16>
    %c0_31 = arith.constant 0 : index
    %c0_32 = arith.constant 0 : index
    %66 = vector.load %arg7[%c0_31, %c0_32] : memref<72x512xbf16, #tpu.memory_space<vmem>>, vector<8x512xbf16>
    tpu.vector_store %arg7[%c0_31, %c0_32], %65 {strides = array<i32>} : memref<72x512xbf16, #tpu.memory_space<vmem>>, vector<8x512xbf16>,
    %c16_i32_33 = arith.constant 16 : i32
    %67 = tpu.dynamic_rotate %59 by %c16_i32_33 dim 1 : vector<8x512xf32>, i32 -> vector<8x512xf32>
    %c1_34 = arith.constant 1 : index
    %c0_35 = arith.constant 0 : index
    %68 = vector.load %arg1[%c1_34, %c0_35] : memref<9x512xf32, #tpu.memory_space<vmem>>, vector<1x512xf32>
    %69 = vector.broadcast %68 : vector<1x512xf32> to vector<8x512xf32>
    %70 = arith.mulf %67, %69 : vector<8x512xf32>
    %71 = arith.truncf %70 : vector<8x512xf32> to vector<8x512xbf16>
    %c8_36 = arith.constant 8 : index
    %c0_37 = arith.constant 0 : index
    %72 = vector.load %arg7[%c8_36, %c0_37] : memref<72x512xbf16, #tpu.memory_space<vmem>>, vector<8x512xbf16>
    tpu.vector_store %arg7[%c8_36, %c0_37], %71 {strides = array<i32>} : memref<72x512xbf16, #tpu.memory_space<vmem>>, vector<8x512xbf16>,
    %c15_i32_38 = arith.constant 15 : i32
    %73 = tpu.dynamic_rotate %59 by %c15_i32_38 dim 1 : vector<8x512xf32>, i32 -> vector<8x512xf32>
    %c2_39 = arith.constant 2 : index
    %c0_40 = arith.constant 0 : index
    %74 = vector.load %arg1[%c2_39, %c0_40] : memref<9x512xf32, #tpu.memory_space<vmem>>, vector<1x512xf32>
    %75 = vector.broadcast %74 : vector<1x512xf32> to vector<8x512xf32>
    %76 = arith.mulf %73, %75 : vector<8x512xf32>
    %77 = arith.truncf %76 : vector<8x512xf32> to vector<8x512xbf16>
    %c16_41 = arith.constant 16 : index
    %c0_42 = arith.constant 0 : index
    %78 = vector.load %arg7[%c16_41, %c0_42] : memref<72x512xbf16, #tpu.memory_space<vmem>>, vector<8x512xbf16>
    tpu.vector_store %arg7[%c16_41, %c0_42], %77 {strides = array<i32>} : memref<72x512xbf16, #tpu.memory_space<vmem>>, vector<8x512xbf16>,
    %c1_i32_43 = arith.constant 1 : i32
    %79 = tpu.dynamic_rotate %59 by %c1_i32_43 dim 1 : vector<8x512xf32>, i32 -> vector<8x512xf32>
    %c3_44 = arith.constant 3 : index
    %c0_45 = arith.constant 0 : index
    %80 = vector.load %arg1[%c3_44, %c0_45] : memref<9x512xf32, #tpu.memory_space<vmem>>, vector<1x512xf32>
    %81 = vector.broadcast %80 : vector<1x512xf32> to vector<8x512xf32>
    %82 = arith.mulf %79, %81 : vector<8x512xf32>
    %83 = arith.truncf %82 : vector<8x512xf32> to vector<8x512xbf16>
    %c24_46 = arith.constant 24 : index
    %c0_47 = arith.constant 0 : index
    %84 = vector.load %arg7[%c24_46, %c0_47] : memref<72x512xbf16, #tpu.memory_space<vmem>>, vector<8x512xbf16>
    tpu.vector_store %arg7[%c24_46, %c0_47], %83 {strides = array<i32>} : memref<72x512xbf16, #tpu.memory_space<vmem>>, vector<8x512xbf16>,
    %85 = arith.truncf %59 : vector<8x512xf32> to vector<8x512xbf16>
    %c32_48 = arith.constant 32 : index
    %c0_49 = arith.constant 0 : index
    %86 = vector.load %arg7[%c32_48, %c0_49] : memref<72x512xbf16, #tpu.memory_space<vmem>>, vector<8x512xbf16>
    tpu.vector_store %arg7[%c32_48, %c0_49], %85 {strides = array<i32>} : memref<72x512xbf16, #tpu.memory_space<vmem>>, vector<8x512xbf16>,
    %c511_i32_50 = arith.constant 511 : i32
    %87 = tpu.dynamic_rotate %59 by %c511_i32_50 dim 1 : vector<8x512xf32>, i32 -> vector<8x512xf32>
    %c5_51 = arith.constant 5 : index
    %c0_52 = arith.constant 0 : index
    %88 = vector.load %arg1[%c5_51, %c0_52] : memref<9x512xf32, #tpu.memory_space<vmem>>, vector<1x512xf32>
    %89 = vector.broadcast %88 : vector<1x512xf32> to vector<8x512xf32>
    %90 = arith.mulf %87, %89 : vector<8x512xf32>
    %91 = arith.truncf %90 : vector<8x512xf32> to vector<8x512xbf16>
    %c40 = arith.constant 40 : index
    %c0_53 = arith.constant 0 : index
    %92 = vector.load %arg7[%c40, %c0_53] : memref<72x512xbf16, #tpu.memory_space<vmem>>, vector<8x512xbf16>
    tpu.vector_store %arg7[%c40, %c0_53], %91 {strides = array<i32>} : memref<72x512xbf16, #tpu.memory_space<vmem>>, vector<8x512xbf16>,
    %c497_i32_54 = arith.constant 497 : i32
    %93 = tpu.dynamic_rotate %59 by %c497_i32_54 dim 1 : vector<8x512xf32>, i32 -> vector<8x512xf32>
    %c6_55 = arith.constant 6 : index
    %c0_56 = arith.constant 0 : index
    %94 = vector.load %arg1[%c6_55, %c0_56] : memref<9x512xf32, #tpu.memory_space<vmem>>, vector<1x512xf32>
    %95 = vector.broadcast %94 : vector<1x512xf32> to vector<8x512xf32>
    %96 = arith.mulf %93, %95 : vector<8x512xf32>
    %97 = arith.truncf %96 : vector<8x512xf32> to vector<8x512xbf16>
    %c48 = arith.constant 48 : index
    %c0_57 = arith.constant 0 : index
    %98 = vector.load %arg7[%c48, %c0_57] : memref<72x512xbf16, #tpu.memory_space<vmem>>, vector<8x512xbf16>
    tpu.vector_store %arg7[%c48, %c0_57], %97 {strides = array<i32>} : memref<72x512xbf16, #tpu.memory_space<vmem>>, vector<8x512xbf16>,
    %c496_i32_58 = arith.constant 496 : i32
    %99 = tpu.dynamic_rotate %59 by %c496_i32_58 dim 1 : vector<8x512xf32>, i32 -> vector<8x512xf32>
    %c7_59 = arith.constant 7 : index
    %c0_60 = arith.constant 0 : index
    %100 = vector.load %arg1[%c7_59, %c0_60] : memref<9x512xf32, #tpu.memory_space<vmem>>, vector<1x512xf32>
    %101 = vector.broadcast %100 : vector<1x512xf32> to vector<8x512xf32>
    %102 = arith.mulf %99, %101 : vector<8x512xf32>
    %103 = arith.truncf %102 : vector<8x512xf32> to vector<8x512xbf16>
    %c56 = arith.constant 56 : index
    %c0_61 = arith.constant 0 : index
    %104 = vector.load %arg7[%c56, %c0_61] : memref<72x512xbf16, #tpu.memory_space<vmem>>, vector<8x512xbf16>
    tpu.vector_store %arg7[%c56, %c0_61], %103 {strides = array<i32>} : memref<72x512xbf16, #tpu.memory_space<vmem>>, vector<8x512xbf16>,
    %c495_i32_62 = arith.constant 495 : i32
    %105 = tpu.dynamic_rotate %59 by %c495_i32_62 dim 1 : vector<8x512xf32>, i32 -> vector<8x512xf32>
    %c8_63 = arith.constant 8 : index
    %c0_64 = arith.constant 0 : index
    %106 = vector.load %arg1[%c8_63, %c0_64] : memref<9x512xf32, #tpu.memory_space<vmem>>, vector<1x512xf32>
    %107 = vector.broadcast %106 : vector<1x512xf32> to vector<8x512xf32>
    %108 = arith.mulf %105, %107 : vector<8x512xf32>
    %109 = arith.truncf %108 : vector<8x512xf32> to vector<8x512xbf16>
    %c64 = arith.constant 64 : index
    %c0_65 = arith.constant 0 : index
    %110 = vector.load %arg7[%c64, %c0_65] : memref<72x512xbf16, #tpu.memory_space<vmem>>, vector<8x512xbf16>
    tpu.vector_store %arg7[%c64, %c0_65], %109 {strides = array<i32>} : memref<72x512xbf16, #tpu.memory_space<vmem>>, vector<8x512xbf16>,
    %c0_66 = arith.constant 0 : index
    %c0_67 = arith.constant 0 : index
    %111 = vector.load %arg4[%c0_66, %c0_67] : memref<8x72xbf16, #tpu.memory_space<vmem>>, vector<8x72xbf16>
    %c0_68 = arith.constant 0 : index
    %c0_69 = arith.constant 0 : index
    %112 = vector.load %arg7[%c0_68, %c0_69] : memref<72x512xbf16, #tpu.memory_space<vmem>>, vector<72x512xbf16>
    %cst_70 = arith.constant dense<0.000000e+00> : vector<8x512xf32>
    %113 = tpu.matmul %111, %112, %cst_70 {dimension_numbers = #tpu.dot_dimension_numbers<[1], [0], [0], [1], [0, 0, 1, 1], [], []>} : vector<8x72xbf16>, vector<72x512xbf16>, vector<8x512xf32> -> vector<8x512xf32>
    %c0_71 = arith.constant 0 : index
    %c1_72 = arith.constant 1 : index
    %114 = vector.load %arg5[%c0_71, %c1_72] : memref<8x2xf32, #tpu.memory_space<vmem>>, vector<8x1xf32>
    %115 = vector.broadcast %114 : vector<8x1xf32> to vector<8x512xf32>
    %116 = arith.addf %113, %115 : vector<8x512xf32>
    %117 = arith.addf %116, %60 : vector<8x512xf32>
    %cst_73 = arith.constant 0.000000e+00 : f32
    %118 = vector.broadcast %cst_73 : f32 to vector<8x512xf32>
    %119 = arith.maximumf %117, %118 : vector<8x512xf32>
    %c0_74 = arith.constant 0 : index
    %c0_75 = arith.constant 0 : index
    %120 = vector.load %arg6[%c0_74, %c0_75] : memref<8x512xf32, #tpu.memory_space<vmem>>, vector<8x512xf32>
    tpu.vector_store %arg6[%c0_74, %c0_75], %119 {strides = array<i32>} : memref<8x512xf32, #tpu.memory_space<vmem>>, vector<8x512xf32>,
    return
  }
  func.func @transform_0(%arg0: i32) -> (i32, i32) {
    %c0_i32 = arith.constant 0 : i32
    %c0_i32_0 = arith.constant 0 : i32
    %c0_i32_1 = arith.constant 0 : i32
    return %c0_i32, %c0_i32_0 : i32, i32
  }
  func.func @transform_1(%arg0: i32) -> (i32, i32) {
    %c0_i32 = arith.constant 0 : i32
    %c0_i32_0 = arith.constant 0 : i32
    return %c0_i32, %arg0 : i32, i32
  }
  func.func @transform_2(%arg0: i32) -> (i32, i32) {
    %c0_i32 = arith.constant 0 : i32
    %c0_i32_0 = arith.constant 0 : i32
    %c0_i32_1 = arith.constant 0 : i32
    return %c0_i32, %c0_i32_0 : i32, i32
  }
  func.func @transform_3(%arg0: i32) -> (i32, i32) {
    %c0_i32 = arith.constant 0 : i32
    %c0_i32_0 = arith.constant 0 : i32
    %c0_i32_1 = arith.constant 0 : i32
    return %c0_i32, %c0_i32_0 : i32, i32
  }
  func.func @transform_4(%arg0: i32) -> (i32, i32) {
    %c0_i32 = arith.constant 0 : i32
    %c0_i32_0 = arith.constant 0 : i32
    %c0_i32_1 = arith.constant 0 : i32
    return %c0_i32, %c0_i32_0 : i32, i32
  }
  func.func @transform_5(%arg0: i32) -> (i32, i32) {
    %c0_i32 = arith.constant 0 : i32
    %c0_i32_0 = arith.constant 0 : i32
    return %c0_i32, %arg0 : i32, i32
  }
}

</mosaic_0001>

<bundles_post_ra>
// kernel: resblock_forward.1
= control target key start
LH: loop header
LB: loop body
LE: loop exit
PB: predicated region body
PF: predicated region fallthrough
CT: control target
= control target key end

     0   :  { %s1905_s18 = smov 0   ;;  %s2426_s0 = inlined_call_operand.vmem [shape: f32[9,512], index: 0, kind: input, shape index: {}]   ;;  %s2427_s1 = inlined_call_operand.vmem [shape: f32[4,1024], index: 1, kind: input, shape index: {}]   ;;  %s2428_s2 = inlined_call_operand.vmem [shape: bf16[16,36], index: 2, kind: input, shape index: {}]   ;;  %s2429_s3 = inlined_call_operand.vmem [shape: bf16[8,72], index: 3, kind: input, shape index: {}]   ;;  %s2430_s4 = inlined_call_operand.vmem [shape: f32[8,2], index: 4, kind: input, shape index: {}]   ;;  %s2431_s5 = inlined_call_operand.vmem [shape: f32[8,1024], index: 5, kind: output, shape index: {}]  }
   0x1 LB: > { %s1660_s19 = sadd.s32 4294967295, %s1863_s18   ;;  %p1664_p0 = scmp.ge.s32.totalorder %s1863_s18, 1  ;;  %s1863_s18 = sphi %s1905_s18, %s15_s18  }
   0x2   : > { %p188_p1 = scmp.lt.s32.totalorder %s1863_s18, 3 }
   0x4   : > { %p189_p2 = pnand %p1664_p0, %p188_p1 }
   0x5   : > { %s1665_s20 = sshll.u32 (!%p189_p2), %s1660_s19, 2  ;;  %s1865_s25 = smov (!%p189_p2), 16   ;;  %v1873_v6 = vmov (!%p189_p2), 0   ;;  %v1957_v7 = vld [vmem:[%s2430_s4] sm:$0xff] (!%p189_p2)  ;;  %v245_v8 = vlaneseq (!%p189_p2)  ;;  %vm799_vm8 = vcmask (!%p189_p2), 1041408   ;;  %vm795_vm9 = vcmask (!%p189_p2), 293888  }
   0x6   : > { %192 = sbr.rel (%p189_p2) target bundleno = 835 (0x343), region = 40  ;;  %p217_p3 = scmp.lt.s32.totalorder (!%p189_p2), %s1665_s20, 7  ;;  %844 = vmatprep.mubr.bf16.mxu0 (!%p189_p2), %v1873_v6  ;;  %887 = vmatprep.mubr.bf16.mxu1 (!%p189_p2), %v1873_v6  ;;  %v1671_v17 = vld [vmem:[%s2426_s0 + $0x1] ss:$8 sm:$0xf] (!%p189_p2)  ;;  %vm1497_vm10 = vcmask (!%p189_p2), 1043456  }
   0x7   : > { %s1866_s26 = smov (!%p189_p2), 1   ;;  %s1867_s27 = smov (!%p189_p2), 17   ;;  %1816 = vset.pattern.permute.xlu0 (!%p189_p2), %v1873_v6  ;;  %v255_v9 = vshrl.u32 (!%p189_p2), %v245_v8, 7  ;;  %v1960_v10 = vand.u32 (!%p189_p2), 127, %v245_v8  ;;  %vm1493_vm11 = vcmask (!%p189_p2), 588800  }
   0x8   : > { %s1868_s28 = smov (!%p189_p2), 15   ;;  %s1869_s29 = smov (!%p189_p2), 127   ;;  %v1677_v21 = vld [vmem:[%s2426_s0 + $0x3] ss:$8 sm:$0xf] (!%p189_p2) }
   0x9   : > { %s1870_s30 = smov (!%p189_p2), 112   ;;  %s1871_s6 = smov (!%p189_p2), 113   ;;  %v1962_v13 = vsub.s32 (!%p189_p2), 0, %v255_v9  ;;  %v1964_v14 = vsub.s32 (!%p189_p2), 1, %v255_v9  ;;  %v1966_v15 = vsub.s32 (!%p189_p2), 2, %v255_v9  ;;  %v1968_v16 = vsub.s32 (!%p189_p2), 3, %v255_v9 }
   0xa   : > { %s1872_s7 = smov (!%p189_p2), 111   ;;  %vm304_vm0 = vcmp.lt.s32.totalorder (!%p189_p2), %v1960_v10, 16  ;;  %vm422_vm1 = vcmp.lt.s32.totalorder (!%p189_p2), %v1960_v10, 1  ;;  %v252_v52 = vld [vmem:[%s2426_s0] ss:$8 sm:$0xf] (!%p189_p2) }
   0xb   : > { %v315_v20 = vrot.slane (!%p189_p2), %v1671_v17, %v1962_v13  ;;  %v327_v22 = vrot.slane (!%p189_p2), %v1671_v17, %v1968_v16  ;;  %v319_v24 = vrot.slane (!%p189_p2), %v1671_v17, %v1964_v14  ;;  %v323_v25 = vrot.slane (!%p189_p2), %v1671_v17, %v1966_v15  ;;  %v1674_v17 = vld [vmem:[%s2426_s0 + $0x2] ss:$8 sm:$0xf] (!%p189_p2) }
   0xc   : > { %v437_v27 = vrot.slane (!%p189_p2), %v1677_v21, %v1964_v14  ;;  %v433_v30 = vrot.slane (!%p189_p2), %v1677_v21, %v1962_v13  ;;  %v441_v34 = vrot.slane (!%p189_p2), %v1677_v21, %v1966_v15  ;;  %v445_v39 = vrot.slane (!%p189_p2), %v1677_v21, %v1968_v16 }
   0xd   : > { %s2435_s20 = smov (!%p217_p3, %s1665_s20), 7  ;;  %vm247_vm2 = vcmp.lt.s32.totalorder %v1960_v10, 17  ;;  %v261_v58 = vrot.slane %v252_v52, %v1964_v14  ;;  %v257_v60 = vrot.slane %v252_v52, %v1962_v13  ;;  %v265_v61 = vrot.slane %v252_v52, %v1966_v15 }
   0xe   : > { %s1666_s21 = sshll.u32 %s2435_s20, 2  ;;  %v269_v62 = vrot.slane %v252_v52, %v1968_v16  ;;  %vm364_vm3 = vcmp.lt.s32.totalorder %v1960_v10, 15  ;;  %vm500_vm4 = vcmp.lt.s32.totalorder %v1960_v10, 127  ;;  %vm618_vm5 = vcmp.lt.s32.totalorder %v1960_v10, 112  ;;  %s1668_s8 = sshll.u32 %s2435_s20, 3 }
   0xf   : > { %s220_s24 = scalar_lea.vmem %s2427_s1, %s1666_s21  ;;  %vm560_vm6 = vcmp.lt.s32.totalorder %v1960_v10, 113  ;;  %vm678_vm7 = vcmp.lt.s32.totalorder %v1960_v10, 111  ;;  %s226_s11 = scalar_lea.vmem %s2431_s5, %s1668_s8 }
  0x10   : > { %v230_v0 = vld [vmem:[%s220_s24 + $0x8] sm:$0xff]  ;;  %v229_v1 = vld [vmem:[%s220_s24] sm:$0xff] }
  0x11   : > { %300 = vrot.lane.b32.xlu1 %v230_v0, %s1865_s25  ;;  %296 = vrot.lane.b32.xlu0 %v229_v1, %s1865_s25  ;;  %v234_v2 = vcombine.high %v230_v0, %v230_v0  ;;  %v233_v3 = vcombine.high %v229_v1, %v229_v1 }
  0x13   : > { %v1770_v4 = vpack.c.bf16 %v233_v3, %v229_v1  ;;  %v1771_v5 = vpack.c.bf16 %v234_v2, %v230_v0 }
  0x15   : > { %302 = vrot.lane.b32.xlu1 %v234_v2, %s1865_s25  ;;  %414 = vrot.lane.b32.xlu0 %v229_v1, %s1866_s26  ;;  %490 = vst [vmem:[#allocation2 + $0x20] sm:$0x33] %v1770_v4  ;;  %491 = vst [vmem:[#allocation2 + $0x28] sm:$0x33] %v1771_v5 }
  0x19   : > { %416 = vrot.lane.b32.xlu1 %v233_v3, %s1866_s26  ;;  %298 = vrot.lane.b32.xlu0 %v233_v3, %s1865_s25 }
  0x1d   : > { %420 = vrot.lane.b32.xlu1 %v234_v2, %s1866_s26  ;;  %418 = vrot.lane.b32.xlu0 %v230_v0, %s1866_s26 }
  0x21   : > { %239 = vrot.lane.b32.xlu1 %v233_v3, %s1867_s27  ;;  %237 = vrot.lane.b32.xlu0 %v229_v1, %s1867_s27 }
  0x25   : > { %243 = vrot.lane.b32.xlu1 %v234_v2, %s1867_s27  ;;  %241 = vrot.lane.b32.xlu0 %v230_v0, %s1867_s27 }
  0x29   : > { %358 = vrot.lane.b32.xlu1 %v233_v3, %s1868_s28  ;;  %356 = vrot.lane.b32.xlu0 %v229_v1, %s1868_s28 }
  0x2d   : > { %362 = vrot.lane.b32.xlu1 %v234_v2, %s1868_s28  ;;  %360 = vrot.lane.b32.xlu0 %v230_v0, %s1868_s28 }
  0x31   : > { %494 = vrot.lane.b32.xlu1 %v233_v3, %s1869_s29  ;;  %492 = vrot.lane.b32.xlu0 %v229_v1, %s1869_s29 }
  0x35   : > { %498 = vrot.lane.b32.xlu1 %v234_v2, %s1869_s29  ;;  %496 = vrot.lane.b32.xlu0 %v230_v0, %s1869_s29 }
  0x39   : > { %612 = vrot.lane.b32.xlu1 %v233_v3, %s1870_s30  ;;  %610 = vrot.lane.b32.xlu0 %v229_v1, %s1870_s30 }
  0x3d   : > { %616 = vrot.lane.b32.xlu1 %v234_v2, %s1870_s30  ;;  %614 = vrot.lane.b32.xlu0 %v230_v0, %s1870_s30 }
  0x41   : > { %554 = vrot.lane.b32.xlu1 %v233_v3, %s1871_s6  ;;  %552 = vrot.lane.b32.xlu0 %v229_v1, %s1871_s6 }
  0x45   : > { %558 = vrot.lane.b32.xlu1 %v234_v2, %s1871_s6  ;;  %556 = vrot.lane.b32.xlu0 %v230_v0, %s1871_s6 }
  0x49   : > { %672 = vrot.lane.b32.xlu1 %v233_v3, %s1872_s7  ;;  %670 = vrot.lane.b32.xlu0 %v229_v1, %s1872_s7 }
  0x4d   : > { %676 = vrot.lane.b32.xlu1 %v234_v2, %s1872_s7  ;;  %674 = vrot.lane.b32.xlu0 %v230_v0, %s1872_s7 }
  0x51   : > { %901 = vperm.xlu0 %1816, %v1957_v7  }
  0x83   : > { %v301_v11 = vpop.permute.xlu1 %300  ;;  %v297_v12 = vpop.permute.xlu0 %296 }
  0x87   : > { %v303_v18 = vpop.permute.xlu1 %302  ;;  %v415_v19 = vpop.permute.xlu0 %414 }
  0x88   : > { %v308_v23 = vsel %vm304_vm0, %v303_v18, %v297_v12  ;;  %v305_v26 = vsel %vm304_vm0, %v301_v11, %v303_v18 }
  0x89   : > { %v332_v31 = vmul.f32 %v315_v20, %v308_v23  ;;  %v335_v35 = vmul.f32 %v327_v22, %v305_v26  ;;  %v379_v22 = vrot.slane %v1674_v17, %v1964_v14  ;;  %v375_v23 = vrot.slane %v1674_v17, %v1962_v13 }
  0x8b   : > { %v417_v28 = vpop.permute.xlu1 %416  ;;  %v299_v29 = vpop.permute.xlu0 %298 }
  0x8c   : > { %v306_v32 = vsel %vm304_vm0, %v299_v29, %v301_v11  ;;  %v307_v33 = vsel %vm304_vm0, %v297_v12, %v299_v29  ;;  %v425_v36 = vsel %vm422_vm1, %v415_v19, %v417_v28 }
  0x8d   : > { %v333_v37 = vmul.f32 %v319_v24, %v307_v33  ;;  %v334_v38 = vmul.f32 %v323_v25, %v306_v32  ;;  %v451_v44 = vmul.f32 %v437_v27, %v425_v36  ;;  %v383_v24 = vrot.slane %v1674_v17, %v1966_v15  ;;  %v1682_v36 = vld [vmem:[%s2426_s0 + $0x5] ss:$8 sm:$0xf] }
  0x8e   : > { %v387_v25 = vrot.slane %v1674_v17, %v1968_v16 }
  0x8f   : > { %v1764_v40 = vpack.c.bf16 %v333_v37, %v332_v31  ;;  %v1765_v41 = vpack.c.bf16 %v335_v35, %v334_v38  ;;  %v421_v42 = vpop.permute.xlu1 %420  ;;  %v419_v43 = vpop.permute.xlu0 %418 }
  0x90   : > { %v426_v45 = vsel %vm422_vm1, %v421_v42, %v415_v19  ;;  %v423_v46 = vsel %vm422_vm1, %v419_v43, %v421_v42  ;;  %v424_v47 = vsel %vm422_vm1, %v417_v28, %v419_v43  ;;  %v523_v42 = vrot.slane %v1682_v36, %v1968_v16 }
  0x91   : > { %v350_v48 = vrot.slane %v1764_v40, 6  ;;  %v351_v49 = vrot.slane %v1765_v41, 6  ;;  %v450_v50 = vmul.f32 %v433_v30, %v426_v45  ;;  %v452_v51 = vmul.f32 %v441_v34, %v424_v47 }
  0x92   : > { %v453_v53 = vmul.f32 %v445_v39, %v423_v46  ;;  %v511_v41 = vrot.slane %v1682_v36, %v1962_v13  ;;  %v515_v43 = vrot.slane %v1682_v36, %v1964_v14 }
  0x93   : > { %354 = vst [vmem:[#allocation2] sm:$0xcc] %v350_v48  ;;  %355 = vst [vmem:[#allocation2 + $0x8] sm:$0xcc] %v351_v49  ;;  %v1768_v54 = vpack.c.bf16 %v451_v44, %v450_v50  ;;  %v240_v55 = vpop.permute.xlu1 %239  ;;  %v238_v56 = vpop.permute.xlu0 %237  ;;  %v519_v44 = vrot.slane %v1682_v36, %v1966_v15 }
  0x94   : > { %v1769_v57 = vpack.c.bf16 %v453_v53, %v452_v51  ;;  %v250_v0 = vsel %vm247_vm2, %v238_v56, %v240_v55 }
  0x95   : > { %v468_v59 = vrot.slane %v1768_v54, 6  ;;  %v275_v8 = vmul.f32 %v261_v58, %v250_v0 }
  0x96   : > { %v469_v63 = vrot.slane %v1769_v57, 6 }
  0x97   : > { %472 = vst [vmem:[#allocation2 + $0x10] sm:$0xcc] %v468_v59  ;;  %v244_v1 = vpop.permute.xlu1 %243  ;;  %v242_v2 = vpop.permute.xlu0 %241 }
  0x98   : > { %473 = vst [vmem:[#allocation2 + $0x18] sm:$0xcc] %v469_v63  ;;  %v251_v3 = vsel %vm247_vm2, %v244_v1, %v238_v56  ;;  %v248_v4 = vsel %vm247_vm2, %v242_v2, %v244_v1  ;;  %v249_v5 = vsel %vm247_vm2, %v240_v55, %v242_v2  ;;  %v1688_v55 = vld [vmem:[%s2426_s0 + $0x7] ss:$8 sm:$0xf] }
  0x99   : > { %v274_v9 = vmul.f32 %v257_v60, %v251_v3  ;;  %v276_v11 = vmul.f32 %v265_v61, %v249_v5  ;;  %v277_v12 = vmul.f32 %v269_v62, %v248_v4  ;;  %v629_v60 = vrot.slane %v1688_v55, %v1962_v13 }
  0x9a   : > { %v641_v61 = vrot.slane %v1688_v55, %v1968_v16  ;;  %v633_v2 = vrot.slane %v1688_v55, %v1964_v14  ;;  %v637_v3 = vrot.slane %v1688_v55, %v1966_v15 }
  0x9b   : > { %v1762_v18 = vpack.c.bf16 %v275_v8, %v274_v9  ;;  %v1763_v19 = vpack.c.bf16 %v277_v12, %v276_v11  ;;  %v359_v20 = vpop.permute.xlu1 %358  ;;  %v357_v21 = vpop.permute.xlu0 %356 }
  0x9c   : > { %v367_v26 = vsel %vm364_vm3, %v357_v21, %v359_v20 }
  0x9d   : > { %294 = vst [vmem:[#allocation2] sm:$0x33] %v1762_v18  ;;  %295 = vst [vmem:[#allocation2 + $0x8] sm:$0x33] %v1763_v19  ;;  %v393_v32 = vmul.f32 %v379_v22, %v367_v26 }
  0x9f   : > { %v363_v27 = vpop.permute.xlu1 %362  ;;  %v361_v28 = vpop.permute.xlu0 %360 }
  0xa0   : > { %v368_v29 = vsel %vm364_vm3, %v363_v27, %v357_v21  ;;  %v365_v30 = vsel %vm364_vm3, %v361_v28, %v363_v27  ;;  %v366_v31 = vsel %vm364_vm3, %v359_v20, %v361_v28 }
  0xa1   : > { %v392_v33 = vmul.f32 %v375_v23, %v368_v29  ;;  %v394_v34 = vmul.f32 %v383_v24, %v366_v31  ;;  %v395_v35 = vmul.f32 %v387_v25, %v365_v30  ;;  %v1685_v23 = vld [vmem:[%s2426_s0 + $0x6] ss:$8 sm:$0xf] }
  0xa2   : > { %v571_v28 = vrot.slane %v1685_v23, %v1962_v13  ;;  %v583_v29 = vrot.slane %v1685_v23, %v1968_v16 }
  0xa3   : > { %v1766_v37 = vpack.c.bf16 %v393_v32, %v392_v33  ;;  %v1767_v38 = vpack.c.bf16 %v395_v35, %v394_v34  ;;  %v495_v39 = vpop.permute.xlu1 %494  ;;  %v493_v40 = vpop.permute.xlu0 %492  ;;  %v575_v32 = vrot.slane %v1685_v23, %v1964_v14  ;;  %v579_v33 = vrot.slane %v1685_v23, %v1966_v15 }
  0xa4   : > { %v503_v45 = vsel %vm500_vm4, %v493_v40, %v495_v39 }
  0xa5   : > { %412 = vst [vmem:[#allocation2 + $0x10] sm:$0x33] %v1766_v37  ;;  %413 = vst [vmem:[#allocation2 + $0x18] sm:$0x33] %v1767_v38  ;;  %v528_v51 = vmul.f32 %v511_v41, %v503_v45 }
  0xa7   : > { %v499_v46 = vpop.permute.xlu1 %498  ;;  %v497_v47 = vpop.permute.xlu0 %496 }
  0xa8   : > { %v504_v48 = vsel %vm500_vm4, %v499_v46, %v493_v40  ;;  %v501_v49 = vsel %vm500_vm4, %v497_v47, %v499_v46  ;;  %v502_v50 = vsel %vm500_vm4, %v495_v39, %v497_v47 }
  0xa9   : > { %v531_v52 = vmul.f32 %v523_v42, %v504_v48  ;;  %v529_v53 = vmul.f32 %v515_v43, %v502_v50  ;;  %v530_v54 = vmul.f32 %v519_v44, %v501_v49  ;;  %v1691_v44 = vld [vmem:[%s2426_s0 + $0x20] ss:$8 sm:$0xf] }
  0xaa   : > { %v689_v49 = vrot.slane %v1691_v44, %v1962_v13  ;;  %v701_v50 = vrot.slane %v1691_v44, %v1968_v16 }
  0xab   : > { %v1772_v56 = vpack.c.bf16 %v529_v53, %v528_v51  ;;  %v1773_v57 = vpack.c.bf16 %v531_v52, %v530_v54  ;;  %v613_v58 = vpop.permute.xlu1 %612  ;;  %v611_v59 = vpop.permute.xlu0 %610  ;;  %v693_v51 = vrot.slane %v1691_v44, %v1964_v14  ;;  %v697_v52 = vrot.slane %v1691_v44, %v1966_v15 }
  0xac   : > { %v1820_v62 = vld [vmem:[#allocation2 + $0x4] ss:$16 sps:$4 sm:$0xff]   ;;  %v1822_v1 = vld [vmem:[#allocation2 + $0xc] ss:$16 sps:$4 sm:$0xff]   ;;  %v1824_v4 = vld [vmem:[#allocation2] ss:$16 sps:$4 sm:$0xff]   ;;  %v621_v5 = vsel %vm618_vm5, %v611_v59, %v613_v58 }
  0xad   : > { %v546_v63 = vrot.slane %v1772_v56, 6  ;;  %v547_v0 = vrot.slane %v1773_v57, 6  ;;  %812 = vmatprep.subr.bf16.mxu0 %v1820_v62  ;;  %v1825_v8 = vld [vmem:[#allocation2 + $0x8] ss:$16 sps:$4 sm:$0xff]   ;;  %855 = vmatprep.subr.bf16.mxu1 %v1822_v1  ;;  %v646_v19 = vmul.f32 %v629_v60, %v621_v5 }
  0xae   : > { %813 = vmatpush1.bf16.msra.mxu0 %v1824_v4  ;;  %856 = vmatpush1.bf16.msra.mxu1 %v1825_v8 }
  0xaf   : > { %550 = vst [vmem:[#allocation2 + $0x20] sm:$0xcc] %v546_v63  ;;  %551 = vst [vmem:[#allocation2 + $0x28] sm:$0xcc] %v547_v0  ;;  %v617_v9 = vpop.permute.xlu1 %616  ;;  %v615_v11 = vpop.permute.xlu0 %614 }
  0xb0   : > { %v622_v12 = vsel %vm618_vm5, %v617_v9, %v611_v59  ;;  %v619_v17 = vsel %vm618_vm5, %v615_v11, %v617_v9  ;;  %v620_v18 = vsel %vm618_vm5, %v613_v58, %v615_v11 }
  0xb1   : > { %v649_v20 = vmul.f32 %v641_v61, %v622_v12  ;;  %v647_v21 = vmul.f32 %v633_v2, %v620_v18  ;;  %v648_v22 = vmul.f32 %v637_v3, %v619_v17 }
  0xb3   : > { %v1776_v24 = vpack.c.bf16 %v647_v21, %v646_v19  ;;  %v1777_v25 = vpack.c.bf16 %v649_v20, %v648_v22  ;;  %v555_v26 = vpop.permute.xlu1 %554  ;;  %v553_v27 = vpop.permute.xlu0 %552  ;;  %v1836_v20 = vld [vmem:[%s2428_s2] sm:$0xff]  }
  0xb4   : > { %v563_v34 = vsel %vm560_vm6, %v553_v27, %v555_v26 }
  0xb5   : > { %v664_v30 = vrot.slane %v1776_v24, 6  ;;  %v665_v31 = vrot.slane %v1777_v25, 6  ;;  %v588_v40 = vmul.f32 %v571_v28, %v563_v34 }
  0xb7   : > { %668 = vst [vmem:[#allocation2 + $0x30] sm:$0xcc] %v664_v30  ;;  %669 = vst [vmem:[#allocation2 + $0x38] sm:$0xcc] %v665_v31  ;;  %v559_v35 = vpop.permute.xlu1 %558  ;;  %v557_v36 = vpop.permute.xlu0 %556 }
  0xb8   : > { %v564_v37 = vsel %vm560_vm6, %v559_v35, %v553_v27  ;;  %v561_v38 = vsel %vm560_vm6, %v557_v36, %v559_v35  ;;  %v562_v39 = vsel %vm560_vm6, %v555_v26, %v557_v36 }
  0xb9   : > { %v591_v41 = vmul.f32 %v583_v29, %v564_v37  ;;  %v589_v42 = vmul.f32 %v575_v32, %v562_v39  ;;  %v590_v43 = vmul.f32 %v579_v33, %v561_v38  ;;  %v1874_v39 = vmov 1  }
  0xba   : > { %1817 = vset.pattern.permute.xlu0 %v1874_v39 }
  0xbb   : > { %v1774_v45 = vpack.c.bf16 %v589_v42, %v588_v40  ;;  %v1775_v46 = vpack.c.bf16 %v591_v41, %v590_v43  ;;  %v673_v47 = vpop.permute.xlu1 %672  ;;  %v671_v48 = vpop.permute.xlu0 %670 }
  0xbc   : > { %v681_v53 = vsel %vm678_vm7, %v671_v48, %v673_v47 }
  0xbd   : > { %608 = vst [vmem:[#allocation2 + $0x30] sm:$0x33] %v1774_v45  ;;  %609 = vst [vmem:[#allocation2 + $0x38] sm:$0x33] %v1775_v46  ;;  %v706_v59 = vmul.f32 %v689_v49, %v681_v53 }
  0xbe   : > { %v924_v53 = vld [vmem:[%s2426_s0] ss:$8 sm:$0xf] }
  0xbf   : > { %v677_v54 = vpop.permute.xlu1 %676  ;;  %v675_v55 = vpop.permute.xlu0 %674 }
  0xc0   : > { %v682_v56 = vsel %vm678_vm7, %v677_v54, %v671_v48  ;;  %v679_v57 = vsel %vm678_vm7, %v675_v55, %v677_v54  ;;  %v680_v58 = vsel %vm678_vm7, %v673_v47, %v675_v55  ;;  %v1713_v54 = vld [vmem:[%s2426_s0 + $0x1] ss:$8 sm:$0xf] }
  0xc1   : > { %v709_v60 = vmul.f32 %v701_v50, %v682_v56  ;;  %v707_v61 = vmul.f32 %v693_v51, %v680_v58  ;;  %v708_v62 = vmul.f32 %v697_v52, %v679_v57  ;;  %v933_v57 = vrot.slane %v924_v53, %v1964_v14  ;;  %v2220_v58 = vld [vmem:[%s2426_s0 + $0x2] ss:$8 sm:$0xf] }
  0xc3   : > { %v1778_v63 = vpack.c.bf16 %v707_v61, %v706_v59  ;;  %v1779_v0 = vpack.c.bf16 %v709_v60, %v708_v62  ;;  %v937_v59 = vrot.slane %v924_v53, %v1966_v15  ;;  %v929_v60 = vrot.slane %v924_v53, %v1962_v13 }
  0xc4   : > { %v1826_v1 = vld [vmem:[#allocation2 + $0x24] ss:$16 sps:$4 sm:$0xff]   ;;  %v1828_v2 = vld [vmem:[#allocation2 + $0x2c] ss:$16 sps:$4 sm:$0xff]   ;;  %v1830_v3 = vld [vmem:[#allocation2 + $0x20] ss:$16 sps:$4 sm:$0xff]   ;;  %v941_v61 = vrot.slane %v924_v53, %v1968_v16  ;;  %v985_v62 = vrot.slane %v1713_v54, %v1962_v13 }
  0xc5   : > { %726 = vst [vmem:[#allocation2 + $0x40] sm:$0x33] %v1778_v63  ;;  %727 = vst [vmem:[#allocation2 + $0x48] sm:$0x33] %v1779_v0  ;;  %v1831_v4 = vld [vmem:[#allocation2 + $0x28] ss:$16 sps:$4 sm:$0xff]   ;;  %814 = vmatprep.subr.bf16.mxu0 %v1826_v1  ;;  %857 = vmatprep.subr.bf16.mxu1 %v1828_v2  ;;  %v997_v2 = vrot.slane %v1713_v54, %v1968_v16 }
  0xc6   : > { %815 = vmatpush1.bf16.msra.mxu0 %v1830_v3  ;;  %858 = vmatpush1.bf16.msra.mxu1 %v1831_v4  ;;  %v2229_v63 = vld [vmem:[%s2426_s0 + $0x3] ss:$8 sm:$0xf]  ;;  %v989_v3 = vrot.slane %v1713_v54, %v1964_v14 }
  0xc7   : > { %v1105_v53 = vrot.slane %v2229_v63, %v1966_v15 }
  0xcc   : > { %v738_v5 = vld [vmem:[#allocation2 + $0x40] sm:$0x33]  ;;  %v739_v8 = vld [vmem:[#allocation2 + $0x48] sm:$0x33] }
  0xcd   : > { %v1704_v9 = vcombine.high %v738_v5, %v738_v5  ;;  %v1706_v11 = vcombine.high %v739_v8, %v739_v8  ;;  %v1703_v12 = vcombine.low %v738_v5, %v738_v5  ;;  %v1705_v17 = vcombine.low %v739_v8, %v739_v8 }
  0xce   : > { %v993_v8 = vrot.slane %v1713_v54, %v1966_v15 }
  0xcf   : > { %1707 = vmatprep.subr.msk.bf16.mxu0 %vm799_vm8, %v1704_v9  ;;  %1709 = vmatprep.subr.msk.bf16.mxu1 %vm799_vm8, %v1706_v11  ;;  %v801_v18 = vsel %vm799_vm8, %v1703_v12, 0  ;;  %v807_v19 = vsel %vm799_vm8, %v1705_v17, 0  ;;  %v1045_v9 = vrot.slane %v2220_v58, %v1964_v14  ;;  %v1049_v11 = vrot.slane %v2220_v58, %v1966_v15 }
  0xd0   : > { %817 = vmatpush1.bf16.msra.mxu0 %v801_v18  ;;  %860 = vmatpush1.bf16.msra.mxu1 %v807_v19  ;;  %v902_v21 = vpop.permute.xlu0 %901  ;;  %v1041_v12 = vrot.slane %v2220_v58, %v1962_v13  ;;  %v1053_v19 = vrot.slane %v2220_v58, %v1968_v16 }
  0xd3   : > { %1708 = vmatmul.mubr.msk.bf16.vlgmr.msra.gmra.mrb[0].mxu0 %vm795_vm9, %v1836_v20  ;;  %1710 = vmatmul.mubr.msk.bf16.vlgmr.msra.gmra.mrb[0].mxu1 %vm795_vm9, %v1836_v20  ;;  %v1097_v20 = vrot.slane %v2229_v63, %v1962_v13 }
  0xd4   : > { %1542 = vmatprep.mubr.bf16.mxu0 %v1873_v6  ;;  %1583 = vmatprep.mubr.bf16.mxu1 %v1873_v6 }
 0x1a6   : > { %v889_v22 = vpop.f32.mrb[0].mxu1  ;;  %v846_v23 = vpop.f32.mrb[0].mxu0 }
 0x1a7   : > { %v906_v24 = vadd.f32 %v902_v21, %v889_v22  ;;  %v904_v25 = vadd.f32 %v902_v21, %v846_v23  ;;  %v848_v26 = vpop.f32.mrb[1].mxu0  ;;  %v891_v27 = vpop.f32.mrb[1].mxu1 }
 0x1a8   : > { %v905_v28 = vadd.f32 %v902_v21, %v848_v26  ;;  %v907_v29 = vadd.f32 %v902_v21, %v891_v27  ;;  %v2103_v30 = vpop.f32.mrb[2].mxu0  ;;  %v2105_v31 = vpop.f32.mrb[2].mxu1  ;;  %v2255_v21 = vld [vmem:[%s2426_s0 + $0x5] ss:$8 sm:$0xf] }
 0x1a9   : > { %v2107_v32 = vmax.f32 %v906_v24, 0.0  ;;  %v2109_v33 = vmax.f32 %v904_v25, 0.0  ;;  %v2111_v34 = vpop.f32.mrb[3].mxu0  ;;  %v2113_v6 = vpop.f32.mrb[3].mxu1  ;;  %v1171_v54 = vrot.slane %v2255_v21, %v1962_v13  ;;  %v1175_v58 = vrot.slane %v2255_v21, %v1964_v14 }
 0x1aa   : > { %v2115_v35 = vmax.f32 %v905_v28, 0.0  ;;  %v2117_v36 = vmax.f32 %v907_v29, 0.0  ;;  %v2266_v26 = vld [vmem:[%s2426_s0 + $0x7] ss:$8 sm:$0xf]  ;;  %v1109_v29 = vrot.slane %v2229_v63, %v1968_v16 }
 0x1ab   : > { %916 = vrot.lane.b32.xlu0 %v2107_v32, %s1867_s27  ;;  %912 = vrot.lane.b32.xlu1 %v2109_v33, %s1867_s27 }
 0x1ac   : > { %v1788_v37 = vpack.c.bf16 %v2115_v35, %v2109_v33  ;;  %v1789_v38 = vpack.c.bf16 %v2117_v36, %v2107_v32 }
 0x1ae   : > { %1152 = vst [vmem:[#allocation2 + $0x40] sm:$0xff] %v1788_v37  ;;  %1153 = vst [vmem:[#allocation2 + $0x48] sm:$0xff] %v1789_v38  ;;  %v1101_v37 = vrot.slane %v2229_v63, %v1964_v14 }
 0x1af   : > { %1024 = vrot.lane.b32.xlu0 %v2109_v33, %s1868_s28  ;;  %968 = vrot.lane.b32.xlu1 %v2109_v33, %s1865_s25 }
 0x1b3   : > { %1028 = vrot.lane.b32.xlu0 %v2107_v32, %s1868_s28  ;;  %972 = vrot.lane.b32.xlu1 %v2107_v32, %s1865_s25 }
 0x1b7   : > { %1154 = vrot.lane.b32.xlu0 %v2109_v33, %s1869_s29  ;;  %1080 = vrot.lane.b32.xlu1 %v2109_v33, %s1866_s26 }
 0x1bb   : > { %1158 = vrot.lane.b32.xlu0 %v2107_v32, %s1869_s29  ;;  %1084 = vrot.lane.b32.xlu1 %v2107_v32, %s1866_s26 }
 0x1bf   : > { %1210 = vrot.lane.b32.xlu0 %v2109_v33, %s1871_s6  ;;  %1266 = vrot.lane.b32.xlu1 %v2109_v33, %s1870_s30 }
 0x1c3   : > { %1214 = vrot.lane.b32.xlu0 %v2107_v32, %s1871_s6  ;;  %1270 = vrot.lane.b32.xlu1 %v2107_v32, %s1870_s30 }
 0x1c7   : > { %1322 = vrot.lane.b32.xlu0 %v2109_v33, %s1872_s7  ;;  %914 = vrot.lane.b32.xlu1 %v2115_v35, %s1867_s27 }
 0x1cb   : > { %918 = vrot.lane.b32.xlu0 %v2117_v36, %s1867_s27  ;;  %974 = vrot.lane.b32.xlu1 %v2117_v36, %s1865_s25 }
 0x1cf   : > { %970 = vrot.lane.b32.xlu0 %v2115_v35, %s1865_s25  ;;  %1026 = vrot.lane.b32.xlu1 %v2115_v35, %s1868_s28 }
 0x1d3   : > { %1030 = vrot.lane.b32.xlu0 %v2117_v36, %s1868_s28  ;;  %1086 = vrot.lane.b32.xlu1 %v2117_v36, %s1866_s26 }
 0x1d7   : > { %1082 = vrot.lane.b32.xlu0 %v2115_v35, %s1866_s26  ;;  %1156 = vrot.lane.b32.xlu1 %v2115_v35, %s1869_s29 }
 0x1db   : > { %1268 = vrot.lane.b32.xlu0 %v2115_v35, %s1870_s30  ;;  %1160 = vrot.lane.b32.xlu1 %v2117_v36, %s1869_s29 }
 0x1df   : > { %1216 = vrot.lane.b32.xlu0 %v2117_v36, %s1871_s6  ;;  %1212 = vrot.lane.b32.xlu1 %v2115_v35, %s1871_s6 }
 0x1e3   : > { %1326 = vrot.lane.b32.xlu0 %v2107_v32, %s1872_s7  ;;  %1272 = vrot.lane.b32.xlu1 %v2117_v36, %s1870_s30 }
 0x1e7   : > { %1324 = vrot.lane.b32.xlu1 %v2115_v35, %s1872_s7  ;;  %1400 = vperm.xlu0 %1817, %v1957_v7  }
 0x1eb   : > { %1328 = vrot.lane.b32.xlu1 %v2117_v36, %s1872_s7 }
 0x21d   : > { %v917_v40 = vpop.permute.xlu0 %916  ;;  %v913_v41 = vpop.permute.xlu1 %912 }
 0x221   : > { %v2188_v42 = vpop.permute.xlu0 %1024  ;;  %v969_v43 = vpop.permute.xlu1 %968 }
 0x225   : > { %v2190_v44 = vpop.permute.xlu0 %1028  ;;  %v973_v45 = vpop.permute.xlu1 %972 }
 0x229   : > { %v2192_v46 = vpop.permute.xlu0 %1154  ;;  %v2194_v47 = vpop.permute.xlu1 %1080 }
 0x22d   : > { %v2196_v48 = vpop.permute.xlu0 %1158  ;;  %v2198_v49 = vpop.permute.xlu1 %1084 }
 0x231   : > { %v2200_v50 = vpop.permute.xlu0 %1210  ;;  %v2202_v51 = vpop.permute.xlu1 %1266 }
 0x235   : > { %v2204_v7 = vpop.permute.xlu0 %1214  ;;  %v2206_v52 = vpop.permute.xlu1 %1270 }
 0x239   : > { %v2214_v55 = vpop.permute.xlu0 %1322  ;;  %v915_v56 = vpop.permute.xlu1 %914 }
 0x23a   : > { %v921_v0 = vsel %vm247_vm2, %v915_v56, %v917_v40  ;;  %v922_v1 = vsel %vm247_vm2, %v913_v41, %v915_v56 }
 0x23b   : > { %v947_v22 = vmul.f32 %v933_v57, %v922_v1  ;;  %v2257_v23 = vmul.f32 %v937_v59, %v921_v0 }
 0x23d   : > { %v919_v4 = vpop.permute.xlu0 %918  ;;  %v975_v5 = vpop.permute.xlu1 %974 }
 0x23e   : > { %v920_v17 = vsel %vm247_vm2, %v917_v40, %v919_v4  ;;  %v923_v18 = vsel %vm247_vm2, %v919_v4, %v913_v41  ;;  %v976_v27 = vsel %vm304_vm0, %v973_v45, %v975_v5  ;;  %v979_v28 = vsel %vm304_vm0, %v975_v5, %v969_v43 }
 0x23f   : > { %v2259_v24 = vmul.f32 %v929_v60, %v923_v18  ;;  %v2261_v25 = vmul.f32 %v941_v61, %v920_v17  ;;  %v2294_v60 = vld [vmem:[%s2426_s0 + $0x6] ss:$8 sm:$0xf]  ;;  %v1002_v61 = vmul.f32 %v985_v62, %v979_v28  ;;  %v1005_v63 = vmul.f32 %v997_v2, %v976_v27 }
 0x240   : > { %v1287_v4 = vrot.slane %v2266_v26, %v1964_v14  ;;  %v1179_v5 = vrot.slane %v2255_v21, %v1966_v15 }
 0x241   : > { %v1780_v38 = vpack.c.bf16 %v947_v22, %v2259_v24  ;;  %v1781_v39 = vpack.c.bf16 %v2261_v25, %v2257_v23  ;;  %v971_v40 = vpop.permute.xlu0 %970  ;;  %v1027_v41 = vpop.permute.xlu1 %1026 }
 0x242   : > { %v977_v56 = vsel %vm304_vm0, %v971_v40, %v973_v45  ;;  %v978_v57 = vsel %vm304_vm0, %v969_v43, %v971_v40  ;;  %v1033_v43 = vsel %vm364_vm3, %v1027_v41, %v2190_v44  ;;  %v1034_v1 = vsel %vm364_vm3, %v2188_v42, %v1027_v41 }
 0x243   : > { %966 = vst [vmem:[#allocation2] sm:$0xff] %v1780_v38  ;;  %967 = vst [vmem:[#allocation2 + $0x8] sm:$0xff] %v1781_v39  ;;  %v1003_v0 = vmul.f32 %v989_v3, %v978_v57  ;;  %v1004_v45 = vmul.f32 %v993_v8, %v977_v56  ;;  %v1183_v3 = vrot.slane %v2255_v21, %v1968_v16 }
 0x244   : > { %v1059_v21 = vmul.f32 %v1045_v9, %v1034_v1  ;;  %v2322_v40 = vmul.f32 %v1049_v11, %v1033_v43  ;;  %v1837_v56 = vpack.c.bf16 %v1002_v61, %v2259_v24  ;;  %v2432_v43 = vrot.slane %v2266_v26, %v1962_v13 }
 0x245   : > { %v1782_v17 = vpack.c.bf16 %v1003_v0, %v1002_v61  ;;  %v1783_v18 = vpack.c.bf16 %v1005_v63, %v1004_v45  ;;  %v1031_v62 = vpop.permute.xlu0 %1030  ;;  %v1087_v2 = vpop.permute.xlu1 %1086  ;;  %v1838_v57 = vpack.c.bf16 %v1003_v0, %v947_v22 }
 0x246   : > { %v1032_v27 = vsel %vm364_vm3, %v2190_v44, %v1031_v62  ;;  %v1035_v28 = vsel %vm364_vm3, %v1031_v62, %v2188_v42  ;;  %v1088_v38 = vsel %vm422_vm1, %v2198_v49, %v1087_v2  ;;  %v1091_v39 = vsel %vm422_vm1, %v1087_v2, %v2194_v47 }
 0x247   : > { %1022 = vst [vmem:[#allocation2 + $0x10] sm:$0xff] %v1782_v17  ;;  %1023 = vst [vmem:[#allocation2 + $0x18] sm:$0xff] %v1783_v18  ;;  %v2324_v41 = vmul.f32 %v1041_v12, %v1035_v28  ;;  %v1061_v44 = vmul.f32 %v1053_v19, %v1032_v27  ;;  %v1839_v42 = vpack.c.bf16 %v1004_v45, %v2257_v23  ;;  %1510 = vmatprep.subr.bf16.mxu0 %v1838_v57 }
 0x248   : > { %v1840_v62 = vpack.c.bf16 %v1005_v63, %v2261_v25  ;;  %v1114_v2 = vmul.f32 %v1097_v20, %v1091_v39  ;;  %v1117_v17 = vmul.f32 %v1109_v29, %v1088_v38  ;;  %v1231_v29 = vrot.slane %v2294_v60, %v1964_v14  ;;  %1511 = vmatpush1.bf16.msra.mxu0 %v1837_v56 }
 0x249   : > { %v1784_v8 = vpack.c.bf16 %v1059_v21, %v2324_v41  ;;  %v1785_v59 = vpack.c.bf16 %v1061_v44, %v2322_v40  ;;  %v1083_v18 = vpop.permute.xlu0 %1082  ;;  %v1157_v9 = vpop.permute.xlu1 %1156 }
 0x24a   : > { %v1089_v11 = vsel %vm422_vm1, %v1083_v18, %v2198_v49  ;;  %v1090_v12 = vsel %vm422_vm1, %v2194_v47, %v1083_v18  ;;  %v1163_v19 = vsel %vm500_vm4, %v1157_v9, %v2196_v48  ;;  %v1164_v22 = vsel %vm500_vm4, %v2192_v46, %v1157_v9  ;;  %1551 = vmatprep.subr.bf16.mxu1 %v1840_v62 }
 0x24b   : > { %1078 = vst [vmem:[#allocation2 + $0x20] sm:$0xff] %v1784_v8  ;;  %1079 = vst [vmem:[#allocation2 + $0x28] sm:$0xff] %v1785_v59  ;;  %v1115_v20 = vmul.f32 %v1101_v37, %v1090_v12  ;;  %v1116_v23 = vmul.f32 %v1105_v53, %v1089_v11  ;;  %v1188_v24 = vmul.f32 %v1171_v54, %v1164_v22  ;;  %1552 = vmatpush1.bf16.msra.mxu1 %v1839_v42 }
 0x24c   : > { %v1189_v25 = vmul.f32 %v1175_v58, %v1163_v19  ;;  %v1239_v49 = vrot.slane %v2294_v60, %v1968_v16  ;;  %v1227_v47 = vrot.slane %v2294_v60, %v1962_v13  ;;  %v1291_v37 = vrot.slane %v2266_v26, %v1966_v15 }
 0x24d   : > { %v1786_v61 = vpack.c.bf16 %v1115_v20, %v1114_v2  ;;  %v1787_v63 = vpack.c.bf16 %v1117_v17, %v1116_v23  ;;  %v1269_v0 = vpop.permute.xlu0 %1268  ;;  %v1161_v59 = vpop.permute.xlu1 %1160  ;;  %v1841_v38 = vpack.c.bf16 %v1114_v2, %v2324_v41  ;;  %v1842_v39 = vpack.c.bf16 %v1115_v20, %v1059_v21 }
 0x24e   : > { %v1275_v53 = vsel %vm618_vm5, %v1269_v0, %v2206_v52  ;;  %v1276_v54 = vsel %vm618_vm5, %v2202_v51, %v1269_v0  ;;  %v1162_v58 = vsel %vm500_vm4, %v2196_v48, %v1161_v59  ;;  %v1165_v45 = vsel %vm500_vm4, %v1161_v59, %v2192_v46 }
 0x24f   : > { %1134 = vst [vmem:[#allocation2 + $0x30] sm:$0xff] %v1786_v61  ;;  %1135 = vst [vmem:[#allocation2 + $0x38] sm:$0xff] %v1787_v63  ;;  %v1300_v1 = vmul.f32 %v2432_v43, %v1276_v54  ;;  %v1301_v8 = vmul.f32 %v1287_v4, %v1275_v53  ;;  %v1190_v27 = vmul.f32 %v1179_v5, %v1162_v58  ;;  %1512 = vmatprep.subr.bf16.mxu0 %v1842_v39 }
 0x250   : > { %v1191_v28 = vmul.f32 %v1183_v3, %v1165_v45  ;;  %v1843_v56 = vpack.c.bf16 %v1116_v23, %v2322_v40  ;;  %v1844_v57 = vpack.c.bf16 %v1117_v17, %v1061_v44  ;;  %v1295_v46 = vrot.slane %v2266_v26, %v1968_v16  ;;  %v1733_v44 = vld [vmem:[%s2426_s0 + $0x20] ss:$8 sm:$0xf]  ;;  %1513 = vmatpush1.bf16.msra.mxu0 %v1841_v38 }
 0x251   : > { %v1217_v48 = vpop.permute.xlu0 %1216  ;;  %v1213_v42 = vpop.permute.xlu1 %1212  ;;  %v1845_v62 = vpack.c.bf16 %v1189_v25, %v2115_v35  ;;  %v2433_v35 = vrot.slane %v2294_v60, %v1966_v15  ;;  %v1339_v9 = vrot.slane %v1733_v44, %v1962_v13  ;;  %v1848_v11 = vpack.c.bf16 %v1188_v24, %v2109_v33 }
 0x252   : > { %v1218_v18 = vsel %vm560_vm6, %v2204_v7, %v1217_v48  ;;  %v1221_v4 = vsel %vm560_vm6, %v1217_v48, %v2200_v50  ;;  %v1219_v5 = vsel %vm560_vm6, %v1213_v42, %v2204_v7  ;;  %v1220_v3 = vsel %vm560_vm6, %v2200_v50, %v1213_v42  ;;  %1553 = vmatprep.subr.bf16.mxu1 %v1844_v57 }
 0x253   : > { %v1246_v26 = vmul.f32 %v2433_v35, %v1218_v18  ;;  %v1247_v21 = vmul.f32 %v1239_v49, %v1221_v4  ;;  %v1244_v40 = vmul.f32 %v1227_v47, %v1220_v3  ;;  %v1245_v41 = vmul.f32 %v1231_v29, %v1219_v5  ;;  %1554 = vmatpush1.bf16.msra.mxu1 %v1843_v56 }
 0x254   : > { %v1846_v7 = vpack.c.bf16 %v1190_v27, %v2107_v32  ;;  %v1847_v2 = vpack.c.bf16 %v1191_v28, %v2117_v36  ;;  %1514 = vmatprep.subr.bf16.mxu0 %v1845_v62  ;;  %v1343_v32 = vrot.slane %v1733_v44, %v1964_v14  ;;  %v1347_v33 = vrot.slane %v1733_v44, %v1966_v15 }
 0x255   : > { %v1273_v50 = vpop.permute.xlu1 %1272  ;;  %v1849_v36 = vpack.c.bf16 %v1301_v8, %v1245_v41  ;;  %1515 = vmatpush1.bf16.msra.mxu0 %v1848_v11  ;;  %v1850_v22 = vpack.c.bf16 %v1300_v1, %v1244_v40  ;;  %v1327_v20 = vpop.permute.xlu0 %1326 }
 0x256   : > { %v1274_v60 = vsel %vm618_vm5, %v2206_v52, %v1273_v50  ;;  %v1277_v17 = vsel %vm618_vm5, %v1273_v50, %v2202_v51  ;;  %1555 = vmatprep.subr.bf16.mxu1 %v1847_v2  ;;  %v1351_v51 = vrot.slane %v1733_v44, %v1968_v16 }
 0x257   : > { %v1302_v12 = vmul.f32 %v1291_v37, %v1274_v60  ;;  %v1303_v19 = vmul.f32 %v1295_v46, %v1277_v17  ;;  %1556 = vmatpush1.bf16.msra.mxu1 %v1846_v7  ;;  %1516 = vmatprep.subr.bf16.mxu0 %v1849_v36  ;;  %v1378_v37 = vld [vmem:[%s2429_s3] sm:$0xf] }
 0x259   : > { %v1325_v23 = vpop.permute.xlu1 %1324  ;;  %v1851_v25 = vpack.c.bf16 %v1302_v12, %v1246_v26  ;;  %v1852_v49 = vpack.c.bf16 %v1303_v19, %v1247_v21  ;;  %1517 = vmatpush1.bf16.msra.mxu0 %v1850_v22 }
 0x25a   : > { %v1331_v52 = vsel %vm678_vm7, %v1325_v23, %v1327_v20  ;;  %v1332_v13 = vsel %vm678_vm7, %v2214_v55, %v1325_v23 }
 0x25b   : > { %v1356_v24 = vmul.f32 %v1339_v9, %v1332_v13  ;;  %v1357_v14 = vmul.f32 %v1343_v32, %v1331_v52  ;;  %1557 = vmatprep.subr.bf16.mxu1 %v1852_v49 }
 0x25c   : > { %1558 = vmatpush1.bf16.msra.mxu1 %v1851_v25 }
 0x25d   : > { %v1329_v47 = vpop.permute.xlu1 %1328  ;;  %v1853_v0 = vpack.c.bf16 %v1357_v14, %v1357_v14  ;;  %v1854_v16 = vpack.c.bf16 %v1356_v24, %v1356_v24 }
 0x25e   : > { %v1330_v29 = vsel %vm678_vm7, %v1327_v20, %v1329_v47  ;;  %v1333_v61 = vsel %vm678_vm7, %v1329_v47, %v2214_v55 }
 0x25f   : > { %v1358_v63 = vmul.f32 %v1347_v33, %v1330_v29  ;;  %v1359_v15 = vmul.f32 %v1351_v51, %v1333_v61  ;;  %1756 = vmatprep.subr.msk.bf16.mxu0 %vm1497_vm10, %v1853_v0  ;;  %v1499_v59 = vsel %vm1497_vm10, %v1854_v16, 0 }
 0x260   : > { %1519 = vmatpush1.bf16.msra.mxu0 %v1499_v59 }
 0x261   : > { %v1855_v53 = vpack.c.bf16 %v1359_v15, %v1359_v15  ;;  %v1856_v54 = vpack.c.bf16 %v1358_v63, %v1358_v63 }
 0x263   : > { %1757 = vmatmul.mubr.msk.bf16.vlgmr.msra.gmra.mrb[4].mxu0 %vm1493_vm11, %v1378_v37  ;;  %1758 = vmatprep.subr.msk.bf16.mxu1 %vm1497_vm10, %v1855_v53  ;;  %v1505_v10 = vsel %vm1497_vm10, %v1856_v54, 0 }
 0x264   : > { %1560 = vmatpush1.bf16.msra.mxu1 %v1505_v10 }
 0x266   : > { %v1401_v55 = vpop.permute.xlu0 %1400 }
 0x267   : > { %1759 = vmatmul.mubr.msk.bf16.vlgmr.msra.gmra.mrb[4].mxu1 %vm1493_vm11, %v1378_v37 }
 0x336   : > { %v1544_v58 = vpop.f32.mrb[4].mxu0 }
 0x337   : > { %v1545_v45 = vadd.f32 %v1544_v58, %v1401_v55  ;;  %v1546_v43 = vpop.f32.mrb[5].mxu0 }
 0x338   : > { %v1547_v1 = vadd.f32 %v1546_v43, %v1401_v55  ;;  %v1548_v8 = vpop.f32.mrb[6].mxu0 }
 0x339   : > { %v1592_v27 = vadd.f32 %v1545_v45, %v2103_v30  ;;  %v1549_v28 = vpop.f32.mrb[7].mxu0 }
 0x33a   : > { %v1593_v38 = vadd.f32 %v1547_v1, %v2111_v34  ;;  %v1585_v39 = vpop.f32.mrb[4].mxu1 }
 0x33b   : > { %v1596_v56 = vmax.f32 %v1592_v27, 0.0  ;;  %v1586_v57 = vadd.f32 %v1585_v39, %v1401_v55  ;;  %v1587_v48 = vpop.f32.mrb[5].mxu1 }
 0x33c   : > { %v1597_v42 = vmax.f32 %v1593_v38, 0.0  ;;  %v1588_v46 = vadd.f32 %v1587_v48, %v1401_v55  ;;  %v1589_v62 = vpop.f32.mrb[6].mxu1 }
 0x33d   : > { %1600 = vst [vmem:[%s226_s11] sm:$0xff] %v1596_v56  ;;  %v1594_v18 = vadd.f32 %v1586_v57, %v2105_v31  ;;  %v1590_v4 = vpop.f32.mrb[7].mxu1 }
 0x33e   : > { %1601 = vst [vmem:[%s226_s11 + $0x8] sm:$0xff] %v1597_v42  ;;  %v1595_v30 = vadd.f32 %v1588_v46, %v2113_v6 }
 0x33f   : > { %v1598_v5 = vmax.f32 %v1594_v18, 0.0 }
 0x340   : > { %v1599_v3 = vmax.f32 %v1595_v30, 0.0 }
 0x341   : > { %1602 = vst [vmem:[%s226_s11 + $0x10] sm:$0xff] %v1598_v5 }
 0x342   : > { %1603 = vst [vmem:[%s226_s11 + $0x18] sm:$0xff] %v1599_v3 }
 0x343 PF: > { %s15_s18 = sadd.s32 1, %s1863_s18  }
 0x344   : > { %p12_p4 = scmp.ge.s32.totalorder %s15_s18, 4  }
 0x346   :  { %14 = sbr.rel (!%p12_p4) target bundleno = 1 (0x1), region = 77 }

</bundles_post_ra>
